<compile_context>
chip_gen: v5e
topology: v5e:2x2
jax: 0.10.0
libtpu: 0.0.40
codegen_flags: <defaults>
</compile_context>

<pallas_src>
import math
import functools

import jax
import jax.numpy as jnp
from jax.experimental import pallas as pl
from jax.experimental.pallas import tpu as pltpu

_LANES = 128


def _ceil_div(a, b):
    return -(-a // b)


def _lambertw_principal(x, iters=3):
    """Principal-branch Lambert W for x >= -1/e (elementwise f32, VPU/EUP only)."""
    e = math.e
    # Initial guess:
    #   x <  0 : branch-point series in p = sqrt(2*(e*x + 1))   (valid on [-1/e, 0))
    #   x >= 0 : log1p(x)
    p = jnp.sqrt(jnp.maximum(2.0 * (e * x + 1.0), 0.0))
    w_branch = -1.0 + p * (1.0 + p * (-1.0 / 3.0 + (11.0 / 72.0) * p))
    w = jnp.where(x < 0.0, w_branch, jnp.log1p(x))
    # Halley iterations with a single fused divide per step:
    #   f = w*e^w - x
    #   w <- w - 2*f*(w+1) / (2*e^w*(w+1)^2 - (w+2)*f)
    # At the branch point (w = -1, f ~ 0) the numerator vanishes, so only the
    # exact 0/0 case needs guarding (denominator guard below).
    for it in range(iters):
        ew = jnp.exp(w)
        f = w * ew - x
        wp1 = w + 1.0
        num = 2.0 * f * wp1
        den = 2.0 * ew * wp1 * wp1 - (w + 2.0) * f
        den = jnp.where(den == 0.0, 1.0, den)
        if it + 1 < iters:
            # EUP approximate reciprocal (rides a different VLIW slot); the
            # final exact divide below squashes any residual error.
            w = w - num * pl.reciprocal(den, approx=True)
        else:
            w = w - num / den
    return w


def _superloss_kernel(tau_ref, loss_ref, out_ref, acc_ref, *, lam, inv_lam, inv_n, iters):
    i = pl.program_id(0)

    @pl.when(i == 0)
    def _init():
        acc_ref[...] = jnp.zeros_like(acc_ref)

    tau = tau_ref[0]                         # SMEM scalar
    loss = loss_ref[...]                     # (block_rows, 128) f32, sublane-dense
    diff = loss - tau
    inner = 0.5 * jnp.maximum(diff * inv_lam, -2.0 / math.e)
    log_sigma = -_lambertw_principal(inner, iters=iters)
    new_loss = jnp.exp(log_sigma) * diff + lam * (log_sigma * log_sigma)
    # Padded elements were filled with tau -> diff == 0 -> new_loss == 0 exactly,
    # so the plain (unmasked) sum is correct.
    acc_ref[...] += jnp.sum(new_loss, keepdims=True)

    @pl.when(i == pl.num_programs(0) - 1)
    def _finalize():
        out_ref[...] = acc_ref[...] * inv_n


def superloss_forward(loss, lam=1.0, max_block_rows=2048):
    """Forward pass of SuperLoss (fresh module, self.ra starts at None)."""
    # TODO(synk): cross-call statefulness of self.ra (history persisting across
    # forward calls) is not modeled; this reproduces a single forward pass.
    # Note: for very small N this is launch-overhead dominated; in a real model
    # this math would be fused into the producer of the per-sample losses.
    loss = loss.astype(jnp.float32)
    n = loss.shape[0]

    # tau: sequential EMA expressed as a closed-form weighted reduction:
    #   w[0] = 0.9^(N-1), w[i>0] = 0.1 * 0.9^(N-1-i)
    # Done as a tiny wrapper-side dot so the kernel streams only one array.
    # (For extremely large N the earliest weights underflow in f32; negligible.)
    idx = jnp.arange(n)
    ema_w = jnp.where(
        idx == 0,
        jnp.float32(0.9) ** (n - 1),
        jnp.float32(0.1) * jnp.float32(0.9) ** (n - 1 - idx),
    ).astype(jnp.float32)
    tau = jnp.dot(ema_w, loss).astype(jnp.float32).reshape(1)   # (1,) -> SMEM

    # Sublane-dense padded layout: (rows, 128), rows a multiple of 8, split into
    # equal row-chunks of at most max_block_rows rows (<= 1 MiB f32 per block,
    # ~2 MiB double-buffered -> fits scoped VMEM on v5e/v6e/v7x).
    rows = _ceil_div(n, _LANES)
    rows = _ceil_div(rows, 8) * 8
    num_chunks = max(1, _ceil_div(rows, max_block_rows))
    block_rows = _ceil_div(_ceil_div(rows, num_chunks), 8) * 8
    rows_padded = block_rows * num_chunks
    total = rows_padded * _LANES

    # Pad with tau so padded elements contribute exactly zero to the sum.
    padded = jnp.full((total,), tau[0], dtype=jnp.float32).at[:n].set(loss)
    loss2d = padded.reshape(rows_padded, _LANES)

    kernel = functools.partial(
        _superloss_kernel,
        lam=float(lam),
        inv_lam=1.0 / float(lam),
        inv_n=1.0 / float(n),
        iters=3,
    )

    out = pl.pallas_call(
        kernel,
        out_shape=jax.ShapeDtypeStruct((1, 1), jnp.float32),
        grid_spec=pltpu.PrefetchScalarGridSpec(
            num_scalar_prefetch=0,
            grid=(num_chunks,),
            in_specs=[
                pl.BlockSpec(memory_space=pltpu.MemorySpace.SMEM),     # tau scalar
                pl.BlockSpec((block_rows, _LANES), lambda i: (i, 0)),  # loss chunks
            ],
            out_specs=pl.BlockSpec((1, 1), lambda i: (0, 0)),
            scratch_shapes=[pltpu.VMEM((1, 1), jnp.float32)],
        ),
        compiler_params=pltpu.CompilerParams(
            dimension_semantics=("arbitrary",),   # reduction axis (accumulator)
        ),
    )(tau, loss2d)
    return out[0, 0]


if __name__ == "__main__":
    key = jax.random.PRNGKey(0)
    # Per-sample losses (e.g. cross-entropy values), batch of 8, all positive.
    loss = jax.random.uniform(key, (8,), dtype=jnp.float32, minval=0.1, maxval=3.0)
    result = superloss_forward(loss, lam=1.0)
    jax.block_until_ready(result)

    # Also exercise the padded multi-row (sublane-dense) layout.
    loss2 = jax.random.uniform(
        jax.random.PRNGKey(1), (300,), dtype=jnp.float32, minval=0.05, maxval=4.0
    )
    result2 = superloss_forward(loss2, lam=1.0)
    jax.block_until_ready(result2)

    if bool(jnp.isfinite(result)) and bool(jnp.isfinite(result2)):
        print("KERNEL_OK")
</pallas_src>

<mosaic_0001>
module attributes {stable_mosaic.version = 11 : i64} {
  func.func @_superloss_kernel(%arg0: i32, %arg1: memref<1xf32, #tpu.memory_space<smem>>, %arg2: memref<8x128xf32, #tpu.memory_space<vmem>>, %arg3: memref<1x1xf32, #tpu.memory_space<vmem>>, %arg4: memref<1x1xf32, #tpu.memory_space<vmem>>) attributes {dimension_semantics = [#tpu.dimension_semantics<arbitrary>], iteration_bounds = array<i64: 1>, scalar_prefetch = 0 : i64, scratch_operands = 1 : i64, tpu.core_type = #tpu.core_type<tc>, window_params = [{transform_indices = @transform_0, window_bounds = array<i64: 1>}, {transform_indices = @transform_1, window_bounds = array<i64: 8, 128>}, {pipeline_mode = #tpu.pipeline_mode<synchronous>, transform_indices = @transform_2, window_bounds = array<i64: 1, 1>}]} {
    %c0_i32 = arith.constant 0 : i32
    %0 = arith.cmpi eq, %arg0, %c0_i32 : i32
    %1 = arith.extui %0 : i1 to i32
    %c0_i32_0 = arith.constant 0 : i32
    %2 = arith.cmpi ne, %1, %c0_i32_0 : i32
    scf.if %2 {
      %cst_41 = arith.constant 0.000000e+00 : f32
      %123 = vector.broadcast %cst_41 : f32 to vector<1x1xf32>
      %c0_42 = arith.constant 0 : index
      %c0_43 = arith.constant 0 : index
      %124 = vector.load %arg4[%c0_42, %c0_43] : memref<1x1xf32, #tpu.memory_space<vmem>>, vector<1x1xf32>
      tpu.vector_store %arg4[%c0_42, %c0_43], %123 {strides = array<i32>} : memref<1x1xf32, #tpu.memory_space<vmem>>, vector<1x1xf32>,
    } else {
    }
    %c0 = arith.constant 0 : index
    %3 = memref.load %arg1[%c0] : memref<1xf32, #tpu.memory_space<smem>>
    %c0_1 = arith.constant 0 : index
    %c0_2 = arith.constant 0 : index
    %4 = vector.load %arg2[%c0_1, %c0_2] : memref<8x128xf32, #tpu.memory_space<vmem>>, vector<8x128xf32>
    %5 = vector.broadcast %3 : f32 to vector<8x128xf32>
    %6 = arith.subf %4, %5 : vector<8x128xf32>
    %cst = arith.constant 1.000000e+00 : f32
    %7 = vector.broadcast %cst : f32 to vector<8x128xf32>
    %8 = arith.mulf %6, %7 : vector<8x128xf32>
    %cst_3 = arith.constant -0.735758901 : f32
    %9 = vector.broadcast %cst_3 : f32 to vector<8x128xf32>
    %10 = arith.maximumf %8, %9 : vector<8x128xf32>
    %cst_4 = arith.constant 5.000000e-01 : f32
    %11 = vector.broadcast %cst_4 : f32 to vector<8x128xf32>
    %12 = arith.mulf %11, %10 : vector<8x128xf32>
    %cst_5 = arith.constant 2.71828175 : f32
    %13 = vector.broadcast %cst_5 : f32 to vector<8x128xf32>
    %14 = arith.mulf %13, %12 : vector<8x128xf32>
    %cst_6 = arith.constant 1.000000e+00 : f32
    %15 = vector.broadcast %cst_6 : f32 to vector<8x128xf32>
    %16 = arith.addf %14, %15 : vector<8x128xf32>
    %cst_7 = arith.constant 2.000000e+00 : f32
    %17 = vector.broadcast %cst_7 : f32 to vector<8x128xf32>
    %18 = arith.mulf %17, %16 : vector<8x128xf32>
    %cst_8 = arith.constant 0.000000e+00 : f32
    %19 = vector.broadcast %cst_8 : f32 to vector<8x128xf32>
    %20 = arith.maximumf %18, %19 : vector<8x128xf32>
    %21 = math.sqrt %20 : vector<8x128xf32>
    %cst_9 = arith.constant 0.152777776 : f32
    %22 = vector.broadcast %cst_9 : f32 to vector<8x128xf32>
    %23 = arith.mulf %22, %21 : vector<8x128xf32>
    %cst_10 = arith.constant -0.333333343 : f32
    %24 = vector.broadcast %cst_10 : f32 to vector<8x128xf32>
    %25 = arith.addf %24, %23 : vector<8x128xf32>
    %26 = arith.mulf %21, %25 : vector<8x128xf32>
    %cst_11 = arith.constant 1.000000e+00 : f32
    %27 = vector.broadcast %cst_11 : f32 to vector<8x128xf32>
    %28 = arith.addf %27, %26 : vector<8x128xf32>
    %29 = arith.mulf %21, %28 : vector<8x128xf32>
    %cst_12 = arith.constant -1.000000e+00 : f32
    %30 = vector.broadcast %cst_12 : f32 to vector<8x128xf32>
    %31 = arith.addf %30, %29 : vector<8x128xf32>
    %cst_13 = arith.constant 0.000000e+00 : f32
    %32 = vector.broadcast %cst_13 : f32 to vector<8x128xf32>
    %33 = arith.cmpf olt, %12, %32 : vector<8x128xf32>
    %34 = math.log1p %12 : vector<8x128xf32>
    %35 = arith.select %33, %31, %34 : vector<8x128xi1>, vector<8x128xf32>
    %36 = math.exp %35 : vector<8x128xf32>
    %37 = arith.mulf %35, %36 : vector<8x128xf32>
    %38 = arith.subf %37, %12 : vector<8x128xf32>
    %cst_14 = arith.constant 1.000000e+00 : f32
    %39 = vector.broadcast %cst_14 : f32 to vector<8x128xf32>
    %40 = arith.addf %35, %39 : vector<8x128xf32>
    %cst_15 = arith.constant 2.000000e+00 : f32
    %41 = vector.broadcast %cst_15 : f32 to vector<8x128xf32>
    %42 = arith.mulf %41, %38 : vector<8x128xf32>
    %43 = arith.mulf %42, %40 : vector<8x128xf32>
    %cst_16 = arith.constant 2.000000e+00 : f32
    %44 = vector.broadcast %cst_16 : f32 to vector<8x128xf32>
    %45 = arith.mulf %44, %36 : vector<8x128xf32>
    %46 = arith.mulf %45, %40 : vector<8x128xf32>
    %47 = arith.mulf %46, %40 : vector<8x128xf32>
    %cst_17 = arith.constant 2.000000e+00 : f32
    %48 = vector.broadcast %cst_17 : f32 to vector<8x128xf32>
    %49 = arith.addf %35, %48 : vector<8x128xf32>
    %50 = arith.mulf %49, %38 : vector<8x128xf32>
    %51 = arith.subf %47, %50 : vector<8x128xf32>
    %cst_18 = arith.constant 0.000000e+00 : f32
    %52 = vector.broadcast %cst_18 : f32 to vector<8x128xf32>
    %53 = arith.cmpf oeq, %51, %52 : vector<8x128xf32>
    %cst_19 = arith.constant 1.000000e+00 : f32
    %54 = vector.broadcast %cst_19 : f32 to vector<8x128xf32>
    %55 = arith.select %53, %54, %51 : vector<8x128xi1>, vector<8x128xf32>
    %56 = tpu.reciprocal %55 {approx = true} : vector<8x128xf32> -> vector<8x128xf32>
    %57 = arith.mulf %43, %56 : vector<8x128xf32>
    %58 = arith.subf %35, %57 : vector<8x128xf32>
    %59 = math.exp %58 : vector<8x128xf32>
    %60 = arith.mulf %58, %59 : vector<8x128xf32>
    %61 = arith.subf %60, %12 : vector<8x128xf32>
    %cst_20 = arith.constant 1.000000e+00 : f32
    %62 = vector.broadcast %cst_20 : f32 to vector<8x128xf32>
    %63 = arith.addf %58, %62 : vector<8x128xf32>
    %cst_21 = arith.constant 2.000000e+00 : f32
    %64 = vector.broadcast %cst_21 : f32 to vector<8x128xf32>
    %65 = arith.mulf %64, %61 : vector<8x128xf32>
    %66 = arith.mulf %65, %63 : vector<8x128xf32>
    %cst_22 = arith.constant 2.000000e+00 : f32
    %67 = vector.broadcast %cst_22 : f32 to vector<8x128xf32>
    %68 = arith.mulf %67, %59 : vector<8x128xf32>
    %69 = arith.mulf %68, %63 : vector<8x128xf32>
    %70 = arith.mulf %69, %63 : vector<8x128xf32>
    %cst_23 = arith.constant 2.000000e+00 : f32
    %71 = vector.broadcast %cst_23 : f32 to vector<8x128xf32>
    %72 = arith.addf %58, %71 : vector<8x128xf32>
    %73 = arith.mulf %72, %61 : vector<8x128xf32>
    %74 = arith.subf %70, %73 : vector<8x128xf32>
    %cst_24 = arith.constant 0.000000e+00 : f32
    %75 = vector.broadcast %cst_24 : f32 to vector<8x128xf32>
    %76 = arith.cmpf oeq, %74, %75 : vector<8x128xf32>
    %cst_25 = arith.constant 1.000000e+00 : f32
    %77 = vector.broadcast %cst_25 : f32 to vector<8x128xf32>
    %78 = arith.select %76, %77, %74 : vector<8x128xi1>, vector<8x128xf32>
    %79 = tpu.reciprocal %78 {approx = true} : vector<8x128xf32> -> vector<8x128xf32>
    %80 = arith.mulf %66, %79 : vector<8x128xf32>
    %81 = arith.subf %58, %80 : vector<8x128xf32>
    %82 = math.exp %81 : vector<8x128xf32>
    %83 = arith.mulf %81, %82 : vector<8x128xf32>
    %84 = arith.subf %83, %12 : vector<8x128xf32>
    %cst_26 = arith.constant 1.000000e+00 : f32
    %85 = vector.broadcast %cst_26 : f32 to vector<8x128xf32>
    %86 = arith.addf %81, %85 : vector<8x128xf32>
    %cst_27 = arith.constant 2.000000e+00 : f32
    %87 = vector.broadcast %cst_27 : f32 to vector<8x128xf32>
    %88 = arith.mulf %87, %84 : vector<8x128xf32>
    %89 = arith.mulf %88, %86 : vector<8x128xf32>
    %cst_28 = arith.constant 2.000000e+00 : f32
    %90 = vector.broadcast %cst_28 : f32 to vector<8x128xf32>
    %91 = arith.mulf %90, %82 : vector<8x128xf32>
    %92 = arith.mulf %91, %86 : vector<8x128xf32>
    %93 = arith.mulf %92, %86 : vector<8x128xf32>
    %cst_29 = arith.constant 2.000000e+00 : f32
    %94 = vector.broadcast %cst_29 : f32 to vector<8x128xf32>
    %95 = arith.addf %81, %94 : vector<8x128xf32>
    %96 = arith.mulf %95, %84 : vector<8x128xf32>
    %97 = arith.subf %93, %96 : vector<8x128xf32>
    %cst_30 = arith.constant 0.000000e+00 : f32
    %98 = vector.broadcast %cst_30 : f32 to vector<8x128xf32>
    %99 = arith.cmpf oeq, %97, %98 : vector<8x128xf32>
    %cst_31 = arith.constant 1.000000e+00 : f32
    %100 = vector.broadcast %cst_31 : f32 to vector<8x128xf32>
    %101 = arith.select %99, %100, %97 : vector<8x128xi1>, vector<8x128xf32>
    %102 = arith.divf %89, %101 : vector<8x128xf32>
    %103 = arith.subf %81, %102 : vector<8x128xf32>
    %cst_32 = arith.constant 0.000000e+00 : f32
    %104 = vector.broadcast %cst_32 : f32 to vector<8x128xf32>
    %105 = arith.subf %104, %103 : vector<8x128xf32>
    %106 = math.exp %105 : vector<8x128xf32>
    %107 = arith.mulf %106, %6 : vector<8x128xf32>
    %108 = arith.mulf %105, %105 : vector<8x128xf32>
    %cst_33 = arith.constant 1.000000e+00 : f32
    %109 = vector.broadcast %cst_33 : f32 to vector<8x128xf32>
    %110 = arith.mulf %109, %108 : vector<8x128xf32>
    %111 = arith.addf %107, %110 : vector<8x128xf32>
    %c0_34 = arith.constant 0 : index
    %c0_35 = arith.constant 0 : index
    %112 = vector.load %arg4[%c0_34, %c0_35] : memref<1x1xf32, #tpu.memory_space<vmem>>, vector<1x1xf32>
    %113 = vector.shape_cast %111 : vector<8x128xf32> to vector<1x8x128xf32>
    %cst_36 = arith.constant dense<0.000000e+00> : vector<1xf32>
    %114 = vector.multi_reduction <add>, %113, %cst_36 [1, 2] : vector<1x8x128xf32> to vector<1xf32>
    %115 = vector.shape_cast %114 : vector<1xf32> to vector<1x1x1xf32>
    %116 = vector.extract %115[0, 0, 0] : f32 from vector<1x1x1xf32>
    %117 = vector.broadcast %116 : f32 to vector<1x1xf32>
    %118 = arith.addf %112, %117 : vector<1x1xf32>
    %c0_37 = arith.constant 0 : index
    %c0_38 = arith.constant 0 : index
    %119 = vector.load %arg4[%c0_37, %c0_38] : memref<1x1xf32, #tpu.memory_space<vmem>>, vector<1x1xf32>
    tpu.vector_store %arg4[%c0_37, %c0_38], %118 {strides = array<i32>} : memref<1x1xf32, #tpu.memory_space<vmem>>, vector<1x1xf32>,
    %c0_i32_39 = arith.constant 0 : i32
    %120 = arith.cmpi eq, %arg0, %c0_i32_39 : i32
    %121 = arith.extui %120 : i1 to i32
    %c0_i32_40 = arith.constant 0 : i32
    %122 = arith.cmpi ne, %121, %c0_i32_40 : i32
    scf.if %122 {
      %c0_41 = arith.constant 0 : index
      %c0_42 = arith.constant 0 : index
      %123 = vector.load %arg4[%c0_41, %c0_42] : memref<1x1xf32, #tpu.memory_space<vmem>>, vector<1x1xf32>
      %cst_43 = arith.constant 1.250000e-01 : f32
      %124 = vector.broadcast %cst_43 : f32 to vector<1x1xf32>
      %125 = arith.mulf %123, %124 : vector<1x1xf32>
      %c0_44 = arith.constant 0 : index
      %c0_45 = arith.constant 0 : index
      %126 = vector.load %arg3[%c0_44, %c0_45] : memref<1x1xf32, #tpu.memory_space<vmem>>, vector<1x1xf32>
      tpu.vector_store %arg3[%c0_44, %c0_45], %125 {strides = array<i32>} : memref<1x1xf32, #tpu.memory_space<vmem>>, vector<1x1xf32>,
    } else {
    }
    return
  }
  func.func @transform_0(%arg0: i32) -> i32 {
    %c0_i32 = arith.constant 0 : i32
    %c0_i32_0 = arith.constant 0 : i32
    return %c0_i32 : i32
  }
  func.func @transform_1(%arg0: i32) -> (i32, i32) {
    %c0_i32 = arith.constant 0 : i32
    %c0_i32_0 = arith.constant 0 : i32
    return %arg0, %c0_i32 : i32, i32
  }
  func.func @transform_2(%arg0: i32) -> (i32, i32) {
    %c0_i32 = arith.constant 0 : i32
    %c0_i32_0 = arith.constant 0 : i32
    %c0_i32_1 = arith.constant 0 : i32
    return %c0_i32, %c0_i32_0 : i32, i32
  }
}

</mosaic_0001>

<bundles_post_ra>
// kernel: tpu_custom_call.1
= control target key start
LH: loop header
LB: loop body
LE: loop exit
PB: predicated region body
PF: predicated region fallthrough
CT: control target
= control target key end

     0   :  { %8 = vsyncpa [#allocation5], 0  ;;  %s302_s0 = inlined_call_operand.<no memory space> [shape: f32[1], index: 0, kind: input, shape index: {}]   ;;  %s303_s1 = inlined_call_operand.hbm [shape: f32[8,128], index: 1, kind: input, shape index: {}]   ;;  %s304_s2 = inlined_call_operand.hbm [shape: f32[1,1], index: 2, kind: output, shape index: {}]  }
   0x1   :  { %9 = vsyncpa [#allocation6], 0  ;;  %s17_s11 = sshll.u32 %s303_s1, 4  ;;  %s257_s12 = smov [#allocation4]   ;;  %s18_s11 = int_to_ptr.hbm [resolvable:$true] %s17_s11 }
   0x2   :  { %s19_s13 = sshll.u32 %s257_s12, 4  ;;  %s20_s13 = int_to_ptr.vmem [resolvable:$true] %s19_s13 }
   0x3   :  { %22 = dma.hbm_to_vmem [thread:$0]  %s18_s11, 128, %s20_s13, [#allocation5]  }
   0x4   :  { %253 = dma.done.wait [#allocation5], 128  }
   0x5   :  { %254 = vsyncadd [#allocation5], 4294967168  ;;  %v35_v0 = vstv %s302_s0  ;;  %v34_v1 = vld [vmem:[#allocation4] sm:$0xff]  ;;  %vm31_vm11 = vcmask 0   ;;  %s259_s1 = smov [#allocation7]   ;;  %s172_s19 = sshll.u32 %s304_s2, 4  ;;  %s173_s19 = int_to_ptr.hbm [resolvable:$true] %s172_s19 }
   0x6   :  { %v281_v2 = vsub.f32 %v34_v1, %v35_v0  ;;  %s170_s16 = sshll.u32 %s259_s1, 4  ;;  %s171_s16 = int_to_ptr.vmem [resolvable:$true] %s170_s16 }
   0x8   :  { %v37_v3 = vmax.f32 %v281_v2, -0.7357589 }
   0xa   :  { %v284_v4 = vmul.f32 0.5, %v37_v3 }
   0xc   :  { %v39_v5 = vmul.f32 2.7182817, %v284_v4  ;;  %v62_v14 = vadd.f32 1.0, %v284_v4  ;;  %v65_v18 = vmul.f32 -0.5, %v284_v4  ;;  %v68_v25 = vand.u32 2147483647, %v284_v4 }
   0xd   :  { %vm61_vm3 = vcmp.lt.f32.partialorder %v284_v4, 0.0 }
   0xe   :  { %v40_v6 = vadd.f32 1.0, %v39_v5  ;;  %v66_v22 = vadd.f32 1.0, %v65_v18  ;;  %vm69_vm2 = vcmp.lt.f32.partialorder %v68_v25, 0.0004427343 }
  0x10   :  { %v41_v7 = vmul.f32 2.0, %v40_v6  ;;  %v67_v28 = vmul.f32 %v66_v22, %v284_v4 }
  0x12   :  { %v42_v8 = vmax.f32 %v41_v7, 0.0 }
  0x14   :  { %187 = vrsqrt.f32 %v42_v8  ;;  %vm50_vm0 = vcmp.eq.f32.partialorder %v42_v8, inf  ;;  %v53_v16 = vand.u32 2147483648, %v42_v8  ;;  %vm52_vm1 = vcmp.eq.f32.partialorder %v42_v8, 0.0 }
  0x15   :  { %189 = vlog2.f32 %v62_v14 }
  0x1a   :  { %v188_v9 = vpop.eup %187 }
  0x1b   :  { %v44_v10 = vmul.f32 %v188_v9, %v42_v8  ;;  %v190_v23 = vpop.eup %189 }
  0x1c   :  { %v64_v27 = vmul.f32 0.6931472, %v190_v23 }
  0x1d   :  { %v45_v11 = vmul.f32 %v188_v9, %v44_v10 }
  0x1e   :  { %v70_v31 = vsel %vm69_vm2, %v67_v28, %v64_v27 }
  0x1f   :  { %v46_v12 = vmul.f32 0.5, %v45_v11 }
  0x21   :  { %v47_v13 = vsub.f32 1.5, %v46_v12 }
  0x23   :  { %v48_v15 = vmul.f32 %v188_v9, %v47_v13 }
  0x25   :  { %v49_v17 = vmul.f32 %v48_v15, %v42_v8 }
  0x27   :  { %v51_v19 = vsel %vm50_vm0, %v42_v8, %v49_v17 }
  0x28   :  { %v54_v20 = vsel %vm52_vm1, %v53_v16, %v51_v19 }
  0x29   :  { %v55_v21 = vmul.f32 0.15277778, %v54_v20 }
  0x2b   :  { %v56_v24 = vadd.f32 -0.33333334, %v55_v21 }
  0x2d   :  { %v57_v26 = vmul.f32 %v56_v24, %v54_v20 }
  0x2f   :  { %v58_v29 = vadd.f32 1.0, %v57_v26 }
  0x31   :  { %v59_v30 = vmul.f32 %v58_v29, %v54_v20 }
  0x33   :  { %v60_v32 = vadd.f32 -1.0, %v59_v30 }
  0x35   :  { %v71_v33 = vsel %vm61_vm3, %v60_v32, %v70_v31 }
  0x36   :  { %v72_v34 = vmul.f32 1.442695, %v71_v33  ;;  %v76_v35 = vadd.f32 1.0, %v71_v33  ;;  %v82_v39 = vadd.f32 2.0, %v71_v33 }
  0x38   :  { %191 = vpow2.f32 %v72_v34 }
  0x3e   :  { %v192_v36 = vpop.eup %191 }
  0x3f   :  { %v74_v37 = vmul.f32 %v192_v36, %v71_v33  ;;  %v79_v38 = vmul.f32 2.0, %v192_v36 }
  0x41   :  { %v75_v40 = vsub.f32 %v74_v37, %v284_v4  ;;  %v80_v41 = vmul.f32 %v79_v38, %v76_v35  ;;  %v258_v37 = vmov 0.0  }
  0x42   :  { %32 = vst.msk [vmem:[#allocation2] sm:$0x1] %vm31_vm11, %v258_v37 }
  0x43   :  { %v81_v42 = vmul.f32 %v80_v41, %v76_v35  ;;  %v83_v43 = vmul.f32 %v82_v39, %v75_v40  ;;  %v77_v45 = vmul.f32 2.0, %v75_v40 }
  0x45   :  { %v84_v44 = vsub.f32 %v81_v42, %v83_v43  ;;  %v78_v47 = vmul.f32 %v77_v45, %v76_v35 }
  0x47   :  { %vm85_vm4 = vcmp.eq.f32.partialorder %v84_v44, 0.0 }
  0x48   :  { %v86_v46 = vsel %vm85_vm4, 1.0, %v84_v44 }
  0x49   :  { %193 = vrcp.f32 %v86_v46  ;;  %v145_v45 = vld [vmem:[#allocation2] sm:$0x1] }
  0x4f   :  { %v194_v48 = vpop.eup %193 }
  0x50   :  { %v88_v49 = vmul.f32 %v194_v48, %v78_v47 }
  0x52   :  { %v89_v50 = vsub.f32 %v71_v33, %v88_v49 }
  0x54   :  { %v90_v51 = vmul.f32 1.442695, %v89_v50  ;;  %v94_v52 = vadd.f32 1.0, %v89_v50  ;;  %v100_v56 = vadd.f32 2.0, %v89_v50 }
  0x56   :  { %195 = vpow2.f32 %v90_v51 }
  0x5c   :  { %v196_v53 = vpop.eup %195 }
  0x5d   :  { %v92_v54 = vmul.f32 %v196_v53, %v89_v50  ;;  %v97_v55 = vmul.f32 2.0, %v196_v53 }
  0x5f   :  { %v93_v57 = vsub.f32 %v92_v54, %v284_v4  ;;  %v98_v58 = vmul.f32 %v97_v55, %v94_v52 }
  0x61   :  { %v99_v59 = vmul.f32 %v98_v58, %v94_v52  ;;  %v101_v60 = vmul.f32 %v100_v56, %v93_v57  ;;  %v95_v62 = vmul.f32 2.0, %v93_v57 }
  0x63   :  { %v102_v61 = vsub.f32 %v99_v59, %v101_v60  ;;  %v96_v0 = vmul.f32 %v95_v62, %v94_v52 }
  0x65   :  { %vm103_vm5 = vcmp.eq.f32.partialorder %v102_v61, 0.0 }
  0x66   :  { %v104_v63 = vsel %vm103_vm5, 1.0, %v102_v61 }
  0x67   :  { %197 = vrcp.f32 %v104_v63 }
  0x6d   :  { %v198_v1 = vpop.eup %197 }
  0x6e   :  { %v106_v3 = vmul.f32 %v198_v1, %v96_v0 }
  0x70   :  { %v107_v5 = vsub.f32 %v89_v50, %v106_v3 }
  0x72   :  { %v108_v6 = vmul.f32 1.442695, %v107_v5  ;;  %v112_v7 = vadd.f32 1.0, %v107_v5  ;;  %v118_v11 = vadd.f32 2.0, %v107_v5 }
  0x74   :  { %199 = vpow2.f32 %v108_v6 }
  0x7a   :  { %v200_v8 = vpop.eup %199 }
  0x7b   :  { %v110_v9 = vmul.f32 %v200_v8, %v107_v5  ;;  %v115_v10 = vmul.f32 2.0, %v200_v8 }
  0x7d   :  { %v111_v12 = vsub.f32 %v110_v9, %v284_v4  ;;  %v116_v13 = vmul.f32 %v115_v10, %v112_v7 }
  0x7f   :  { %v117_v14 = vmul.f32 %v116_v13, %v112_v7  ;;  %v119_v15 = vmul.f32 %v118_v11, %v111_v12  ;;  %v113_v20 = vmul.f32 2.0, %v111_v12 }
  0x81   :  { %v120_v16 = vsub.f32 %v117_v14, %v119_v15  ;;  %v114_v26 = vmul.f32 %v113_v20, %v112_v7 }
  0x83   :  { %vm121_vm6 = vcmp.eq.f32.partialorder %v120_v16, 0.0 }
  0x84   :  { %v122_v17 = vsel %vm121_vm6, 1.0, %v120_v16 }
  0x85   :  { %201 = vrcp.f32 %v122_v17  ;;  %v134_v21 = vand.u32 2147483648, %v122_v17  ;;  %vm128_vm7 = vweird.f32 %v122_v17  ;;  %v132_v23 = vand.u32 2147483647, %v122_v17 }
  0x87   :  { %v135_v25 = vor.u32 1.1754944e-38, %v134_v21  ;;  %vm133_vm10 = vcmp.eq.f32.partialorder %v132_v23, 8.507059e+37 }
  0x8b   :  { %v202_v18 = vpop.eup %201 }
  0x8c   :  { %v124_v19 = vmul.f32 %v202_v18, %v122_v17  ;;  %vm129_vm8 = vweird.f32 %v202_v18 }
  0x8d   :  { %vm130_vm9 = vmor %vm128_vm7, %vm129_vm8 }
  0x8e   :  { %v125_v22 = vsub.f32 1.0, %v124_v19 }
  0x90   :  { %v126_v24 = vmul.f32 %v202_v18, %v125_v22 }
  0x92   :  { %v127_v4 = vadd.f32 %v202_v18, %v126_v24 }
  0x94   :  { %v131_v27 = vsel %vm130_vm9, %v202_v18, %v127_v4 }
  0x95   :  { %v136_v28 = vsel %vm133_vm10, %v135_v25, %v131_v27 }
  0x96   :  { %v137_v29 = vmul.f32 %v136_v28, %v114_v26 }
  0x98   :  { %v138_v30 = vsub.f32 %v107_v5, %v137_v29 }
  0x9a   :  { %v139_v31 = vsub.f32 0.0, %v138_v30 }
  0x9c   :  { %v140_v32 = vmul.f32 1.442695, %v139_v31  ;;  %v143_v33 = vmul.f32 %v139_v31, %v139_v31 }
  0x9e   :  { %203 = vpow2.f32 %v140_v32 }
  0xa4   :  { %v204_v34 = vpop.eup %203 }
  0xa5   :  { %v142_v35 = vmul.f32 %v204_v34, %v281_v2 }
  0xa7   :  { %v144_v36 = vadd.f32 %v143_v33, %v142_v35 }
  0xa9   :  { %146 = vadd.xlane.f32.xlu0 %v144_v36 }
 0x11c   :  { %v147_v38 = vpop.xlane.xlu0 %146 }
 0x11d   :  { %v148_v39 = vrot.slane %v147_v38, 4 }
 0x11f   :  { %v149_v40 = vadd.f32 %v148_v39, %v147_v38 }
 0x121   :  { %v150_v41 = vrot.slane %v149_v40, 2 }
 0x123   :  { %v151_v42 = vadd.f32 %v150_v41, %v149_v40 }
 0x125   :  { %v152_v43 = vrot.slane %v151_v42, 1 }
 0x127   :  { %v153_v44 = vadd.f32 %v152_v43, %v151_v42 }
 0x129   :  { %182 = vpush %v153_v44 }
 0x15a   :  { %s183_s0 = spop %182 }
 0x15b   :  { %v155_v46 = vstv %s183_s0 }
 0x15c   :  { %v156_v47 = vadd.f32 %v155_v46, %v145_v45 }
 0x15e   :  { %158 = vst.msk [vmem:[#allocation2] sm:$0x1] %vm31_vm11, %v156_v47 }
 0x165   :  { %v162_v2 = vld [vmem:[#allocation2] sm:$0x1] }
 0x166   :  { %v163_v48 = vmul.f32 0.125, %v162_v2 }
 0x168   :  { %164 = vst.msk [vmem:[#allocation7] sm:$0x1] %vm31_vm11, %v163_v48 }
 0x169   :  { %175 = dma.vmem_to_hbm [thread:$0]  %s171_s16, 16, %s173_s19, [#allocation6]  }
 0x16a   :  { %255 = dma.done.wait [#allocation6], 16  }
 0x16b   :  { %256 = vsyncadd [#allocation6], 4294967280 }
 0x16c   :  { %180 = vsyncpa [#allocation5], 1 }
 0x16d   :  { %181 = vsyncpa [#allocation6], 1 }

</bundles_post_ra>
